<compile_context>
chip_gen: v6e
topology: v6e:2x2x1
jax: 0.10.0
libtpu: 0.0.40
codegen_flags: <defaults>
</compile_context>

<pallas_src>
import math

import jax
import jax.numpy as jnp
from jax.experimental import pallas as pl
from jax.experimental.pallas import tpu as pltpu


def _neg_log_sigmoid(z):
    # -logsigmoid(z) = -min(z, 0) + log1p(exp(-|z|))   (numerically stable, VPU/EUP ops only)
    return -jnp.minimum(z, 0.0) + jnp.log1p(jnp.exp(-jnp.abs(z)))


def _scl_kernel(exp_temp_ref, bias_ref, a_ref, t_ref, o_ref):
    """Grid point (l, j_tile, i_tile): one (tI, tJ) sims tile on the MXU, reduced over rows."""
    l = pl.program_id(0)
    j_idx = pl.program_id(1)
    i_idx = pl.program_id(2)

    # Output block is resident across the i (audio-tile) axis: init once, accumulate after.
    @pl.when(i_idx == 0)
    def _():
        o_ref[...] = jnp.zeros_like(o_ref)

    a = a_ref[0]  # (tI, D), native dtype (bf16 or f32)
    t = t_ref[0]  # (tJ, D)
    tI = a.shape[0]
    tJ = t.shape[0]

    # sims[i, j] = sum_d a[i, d] * t[j, d]  — contract last dims directly (no transpose), f32 acc.
    sims = jax.lax.dot_general(
        a, t,
        dimension_numbers=(((1,), (1,)), ((), ())),
        preferred_element_type=jnp.float32,
    )
    sims = sims * exp_temp_ref[l] + bias_ref[l]

    # Does this tile intersect the global diagonal?
    i0 = i_idx * tI
    j0 = j_idx * tJ
    is_diag = jnp.logical_and(i0 < j0 + tJ, j0 < i0 + tI)

    @pl.when(is_diag)
    def _():
        row = i0 + jax.lax.broadcasted_iota(jnp.int32, sims.shape, 0)
        col = j0 + jax.lax.broadcasted_iota(jnp.int32, sims.shape, 1)
        z = jnp.where(row == col, sims, -sims)          # labels: +1 on diag, -1 elsewhere
        o_ref[...] += jnp.sum(_neg_log_sigmoid(z), axis=0, keepdims=True)

    @pl.when(jnp.logical_not(is_diag))
    def _():
        # labels are uniformly -1 off the diagonal: z = -sims, no iota / compare / select needed.
        o_ref[...] += jnp.sum(_neg_log_sigmoid(-sims), axis=0, keepdims=True)


def _pick_tile(dim, preferred=(512, 256, 128)):
    """Largest MXU/lane-friendly tile that evenly divides `dim`; fall back to the full extent."""
    for t in preferred:
        if dim % t == 0:
            return t
    return dim


def sigmoid_contrastive_loss(audio_latents, text_latents, temperatures, bias,
                             *, tile_i=None, tile_j=None):
    """Pallas wrapper. audio: (L,I,D) or (I,D); text: (L,J,D) or (J,D). Returns scalar f32 loss."""
    if audio_latents.ndim == 2:
        audio_latents = audio_latents[None]
    if text_latents.ndim == 2:
        text_latents = text_latents[None]

    L, I, D = audio_latents.shape
    Lt, J, Dt = text_latents.shape
    assert L == Lt and D == Dt

    # Keep the latents in their native dtype (bf16 feeds the MXU directly with f32 accumulation).
    # Scalar parameters: hoist exp(temperatures) out of the kernel.
    exp_temp = jnp.exp(jnp.asarray(temperatures, jnp.float32).reshape(L))
    bias_flat = jnp.asarray(bias, jnp.float32).reshape(L)

    # Tile sizes: multiples of 128/256 when the batch dims allow it; sized so that
    # 2 inputs * 2 buffers * t*D + a (tI, tJ) f32 sims tile stay well inside 32 MiB scoped VMEM
    # (safe on v7x's 64 MiB physical VMEM as well).
    tI = tile_i if tile_i is not None else _pick_tile(I)
    tJ = tile_j if tile_j is not None else _pick_tile(J)
    assert I % tI == 0 and J % tJ == 0

    grid = (L, J // tJ, I // tI)

    partials = pl.pallas_call(
        _scl_kernel,
        out_shape=jax.ShapeDtypeStruct((L, J), jnp.float32),
        grid_spec=pltpu.PrefetchScalarGridSpec(
            num_scalar_prefetch=0,
            grid=grid,
            in_specs=[
                pl.BlockSpec(memory_space=pltpu.MemorySpace.SMEM),      # exp(temperatures) (L,)
                pl.BlockSpec(memory_space=pltpu.MemorySpace.SMEM),      # bias (L,)
                pl.BlockSpec((1, tI, D), lambda l, j, i: (l, i, 0)),    # audio tile
                pl.BlockSpec((1, tJ, D), lambda l, j, i: (l, j, 0)),    # text tile
            ],
            # Lane-dense per-(l, j-tile) partial sums; resident across the i (accumulation) axis.
            out_specs=pl.BlockSpec((1, tJ), lambda l, j, i: (l, j)),
        ),
        compiler_params=pltpu.CompilerParams(
            dimension_semantics=("parallel", "parallel", "arbitrary"),
        ),
    )(exp_temp, bias_flat, audio_latents, text_latents)

    # Final reduction + global normalization (n = global text count J) outside the kernel.
    return jnp.sum(partials) / J


def _reference_loss(audio, text, temperatures, bias):
    """Pure-JAX reference mirroring the PyTorch forward (single device path)."""
    if audio.ndim == 2:
        audio = audio[None]
    if text.ndim == 2:
        text = text[None]
    n = text.shape[1]
    sims = jnp.einsum("lid,ljd->lij", audio.astype(jnp.float32), text.astype(jnp.float32))
    sims = sims * jnp.exp(temperatures) + bias
    labels = 2.0 * jnp.eye(n)[None] - jnp.ones_like(sims)
    return -jnp.sum(jax.nn.log_sigmoid(labels * sims)) / n


if __name__ == "__main__":
    layers = 1          # module default
    batch = 8           # i == j == n
    dim = 32

    # Deterministic parameter init (matches nn.Parameter init in __init__)
    init_temp, init_bias = 10.0, -10.0
    temperatures = jnp.ones((layers, 1, 1), jnp.float32) * math.log(init_temp)
    bias = jnp.ones((layers, 1, 1), jnp.float32) * init_bias

    # Deterministic example inputs (2-D, exercising the '... -> 1 ...' promotion path)
    key = jax.random.PRNGKey(0)
    k_a, k_t = jax.random.split(key)
    audio_latents = jax.random.normal(k_a, (batch, dim), jnp.float32)
    text_latents = jax.random.normal(k_t, (batch, dim), jnp.float32)

    loss = sigmoid_contrastive_loss(audio_latents, text_latents, temperatures, bias)
    loss = jax.block_until_ready(loss)

    ref = _reference_loss(audio_latents, text_latents, temperatures, bias)
    assert jnp.allclose(loss, ref, rtol=1e-5, atol=1e-5), (loss, ref)

    print("KERNEL_OK")
</pallas_src>

<mosaic_0001>
module attributes {stable_mosaic.version = 11 : i64} {
  func.func @_scl_kernel(%arg0: i32, %arg1: i32, %arg2: i32, %arg3: memref<1xf32, #tpu.memory_space<smem>>, %arg4: memref<1xf32, #tpu.memory_space<smem>>, %arg5: memref<1x8x32xf32, #tpu.memory_space<vmem>>, %arg6: memref<1x8x32xf32, #tpu.memory_space<vmem>>, %arg7: memref<1x8xf32, #tpu.memory_space<vmem>>) attributes {dimension_semantics = [#tpu.dimension_semantics<parallel>, #tpu.dimension_semantics<parallel>, #tpu.dimension_semantics<arbitrary>], iteration_bounds = array<i64: 1, 1, 1>, scalar_prefetch = 0 : i64, scratch_operands = 0 : i64, tpu.core_type = #tpu.core_type<tc>, window_params = [{transform_indices = @transform_0, window_bounds = array<i64: 1>}, {transform_indices = @transform_1, window_bounds = array<i64: 1>}, {transform_indices = @transform_2, window_bounds = array<i64: 1, 8, 32>}, {transform_indices = @transform_3, window_bounds = array<i64: 1, 8, 32>}, {transform_indices = @transform_4, window_bounds = array<i64: 1, 8>}]} {
    %c0_i32 = arith.constant 0 : i32
    %0 = arith.cmpi eq, %arg2, %c0_i32 : i32
    %1 = arith.extui %0 : i1 to i32
    %c0_i32_0 = arith.constant 0 : i32
    %2 = arith.cmpi ne, %1, %c0_i32_0 : i32
    scf.if %2 {
      %cst_11 = arith.constant 0.000000e+00 : f32
      %28 = vector.broadcast %cst_11 : f32 to vector<1x8xf32>
      %c0_12 = arith.constant 0 : index
      %c0_13 = arith.constant 0 : index
      %29 = vector.load %arg7[%c0_12, %c0_13] : memref<1x8xf32, #tpu.memory_space<vmem>>, vector<1x8xf32>
      tpu.vector_store %arg7[%c0_12, %c0_13], %28 {strides = array<i32>} : memref<1x8xf32, #tpu.memory_space<vmem>>, vector<1x8xf32>,
    } else {
    }
    %c0 = arith.constant 0 : index
    %c0_1 = arith.constant 0 : index
    %c0_2 = arith.constant 0 : index
    %3 = vector.load %arg5[%c0, %c0_1, %c0_2] : memref<1x8x32xf32, #tpu.memory_space<vmem>>, vector<1x8x32xf32>
    %4 = vector.shape_cast %3 : vector<1x8x32xf32> to vector<8x32xf32>
    %c0_3 = arith.constant 0 : index
    %c0_4 = arith.constant 0 : index
    %c0_5 = arith.constant 0 : index
    %5 = vector.load %arg6[%c0_3, %c0_4, %c0_5] : memref<1x8x32xf32, #tpu.memory_space<vmem>>, vector<1x8x32xf32>
    %6 = vector.shape_cast %5 : vector<1x8x32xf32> to vector<8x32xf32>
    %cst = arith.constant dense<0.000000e+00> : vector<8x8xf32>
    %7 = tpu.matmul %4, %6, %cst {dimension_numbers = #tpu.dot_dimension_numbers<[1], [1], [0], [0], [0, 0, 1, 0], [], []>} : vector<8x32xf32>, vector<8x32xf32>, vector<8x8xf32> -> vector<8x8xf32>
    %8 = arith.index_cast %arg0 : i32 to index
    %9 = memref.load %arg3[%8] : memref<1xf32, #tpu.memory_space<smem>>
    %10 = vector.broadcast %9 : f32 to vector<8x8xf32>
    %11 = arith.mulf %7, %10 : vector<8x8xf32>
    %12 = arith.index_cast %arg0 : i32 to index
    %13 = memref.load %arg4[%12] : memref<1xf32, #tpu.memory_space<smem>>
    %14 = vector.broadcast %13 : f32 to vector<8x8xf32>
    %15 = arith.addf %11, %14 : vector<8x8xf32>
    %c8_i32 = arith.constant 8 : i32
    %16 = arith.muli %arg2, %c8_i32 : i32
    %c8_i32_6 = arith.constant 8 : i32
    %17 = arith.muli %arg1, %c8_i32_6 : i32
    %c8_i32_7 = arith.constant 8 : i32
    %18 = arith.addi %17, %c8_i32_7 : i32
    %19 = arith.cmpi slt, %16, %18 : i32
    %c8_i32_8 = arith.constant 8 : i32
    %20 = arith.addi %16, %c8_i32_8 : i32
    %21 = arith.cmpi slt, %17, %20 : i32
    %22 = arith.andi %19, %21 : i1
    %23 = arith.extui %22 : i1 to i32
    %c0_i32_9 = arith.constant 0 : i32
    %24 = arith.cmpi ne, %23, %c0_i32_9 : i32
    scf.if %24 {
      %28 = tpu.iota {dimensions = array<i32: 0>} : vector<8x8xi32>
      %29 = vector.broadcast %16 : i32 to vector<8x8xi32>
      %30 = arith.addi %29, %28 : vector<8x8xi32>
      %31 = tpu.iota {dimensions = array<i32: 1>} : vector<8x8xi32>
      %32 = vector.broadcast %17 : i32 to vector<8x8xi32>
      %33 = arith.addi %32, %31 : vector<8x8xi32>
      %34 = arith.cmpi eq, %30, %33 : vector<8x8xi32>
      %cst_11 = arith.constant 0.000000e+00 : f32
      %35 = vector.broadcast %cst_11 : f32 to vector<8x8xf32>
      %36 = arith.subf %35, %15 : vector<8x8xf32>
      %37 = arith.select %34, %15, %36 : vector<8x8xi1>, vector<8x8xf32>
      %c0_12 = arith.constant 0 : index
      %c0_13 = arith.constant 0 : index
      %38 = vector.load %arg7[%c0_12, %c0_13] : memref<1x8xf32, #tpu.memory_space<vmem>>, vector<1x8xf32>
      %cst_14 = arith.constant 0.000000e+00 : f32
      %39 = vector.broadcast %cst_14 : f32 to vector<8x8xf32>
      %40 = arith.minimumf %37, %39 : vector<8x8xf32>
      %cst_15 = arith.constant 0.000000e+00 : f32
      %41 = vector.broadcast %cst_15 : f32 to vector<8x8xf32>
      %42 = arith.subf %41, %40 : vector<8x8xf32>
      %43 = math.absf %37 : vector<8x8xf32>
      %cst_16 = arith.constant 0.000000e+00 : f32
      %44 = vector.broadcast %cst_16 : f32 to vector<8x8xf32>
      %45 = arith.subf %44, %43 : vector<8x8xf32>
      %46 = math.exp %45 : vector<8x8xf32>
      %47 = math.log1p %46 : vector<8x8xf32>
      %48 = arith.addf %42, %47 : vector<8x8xf32>
      %cst_17 = arith.constant dense<0.000000e+00> : vector<8xf32>
      %49 = vector.multi_reduction <add>, %48, %cst_17 [0] : vector<8x8xf32> to vector<8xf32>
      %50 = vector.shape_cast %49 : vector<8xf32> to vector<1x8xf32>
      %51 = arith.addf %38, %50 : vector<1x8xf32>
      %c0_18 = arith.constant 0 : index
      %c0_19 = arith.constant 0 : index
      %52 = vector.load %arg7[%c0_18, %c0_19] : memref<1x8xf32, #tpu.memory_space<vmem>>, vector<1x8xf32>
      tpu.vector_store %arg7[%c0_18, %c0_19], %51 {strides = array<i32>} : memref<1x8xf32, #tpu.memory_space<vmem>>, vector<1x8xf32>,
    } else {
    }
    %true = arith.constant true
    %25 = arith.xori %22, %true : i1
    %26 = arith.extui %25 : i1 to i32
    %c0_i32_10 = arith.constant 0 : i32
    %27 = arith.cmpi ne, %26, %c0_i32_10 : i32
    scf.if %27 {
      %c0_11 = arith.constant 0 : index
      %c0_12 = arith.constant 0 : index
      %28 = vector.load %arg7[%c0_11, %c0_12] : memref<1x8xf32, #tpu.memory_space<vmem>>, vector<1x8xf32>
      %cst_13 = arith.constant 0.000000e+00 : f32
      %29 = vector.broadcast %cst_13 : f32 to vector<8x8xf32>
      %30 = arith.subf %29, %15 : vector<8x8xf32>
      %cst_14 = arith.constant 0.000000e+00 : f32
      %31 = vector.broadcast %cst_14 : f32 to vector<8x8xf32>
      %32 = arith.minimumf %30, %31 : vector<8x8xf32>
      %cst_15 = arith.constant 0.000000e+00 : f32
      %33 = vector.broadcast %cst_15 : f32 to vector<8x8xf32>
      %34 = arith.subf %33, %32 : vector<8x8xf32>
      %35 = math.absf %30 : vector<8x8xf32>
      %cst_16 = arith.constant 0.000000e+00 : f32
      %36 = vector.broadcast %cst_16 : f32 to vector<8x8xf32>
      %37 = arith.subf %36, %35 : vector<8x8xf32>
      %38 = math.exp %37 : vector<8x8xf32>
      %39 = math.log1p %38 : vector<8x8xf32>
      %40 = arith.addf %34, %39 : vector<8x8xf32>
      %cst_17 = arith.constant dense<0.000000e+00> : vector<8xf32>
      %41 = vector.multi_reduction <add>, %40, %cst_17 [0] : vector<8x8xf32> to vector<8xf32>
      %42 = vector.shape_cast %41 : vector<8xf32> to vector<1x8xf32>
      %43 = arith.addf %28, %42 : vector<1x8xf32>
      %c0_18 = arith.constant 0 : index
      %c0_19 = arith.constant 0 : index
      %44 = vector.load %arg7[%c0_18, %c0_19] : memref<1x8xf32, #tpu.memory_space<vmem>>, vector<1x8xf32>
      tpu.vector_store %arg7[%c0_18, %c0_19], %43 {strides = array<i32>} : memref<1x8xf32, #tpu.memory_space<vmem>>, vector<1x8xf32>,
    } else {
    }
    return
  }
  func.func @transform_0(%arg0: i32, %arg1: i32, %arg2: i32) -> i32 {
    %c0_i32 = arith.constant 0 : i32
    %c0_i32_0 = arith.constant 0 : i32
    return %c0_i32 : i32
  }
  func.func @transform_1(%arg0: i32, %arg1: i32, %arg2: i32) -> i32 {
    %c0_i32 = arith.constant 0 : i32
    %c0_i32_0 = arith.constant 0 : i32
    return %c0_i32 : i32
  }
  func.func @transform_2(%arg0: i32, %arg1: i32, %arg2: i32) -> (i32, i32, i32) {
    %c0_i32 = arith.constant 0 : i32
    %c0_i32_0 = arith.constant 0 : i32
    return %arg0, %arg2, %c0_i32 : i32, i32, i32
  }
  func.func @transform_3(%arg0: i32, %arg1: i32, %arg2: i32) -> (i32, i32, i32) {
    %c0_i32 = arith.constant 0 : i32
    %c0_i32_0 = arith.constant 0 : i32
    return %arg0, %arg1, %c0_i32 : i32, i32, i32
  }
  func.func @transform_4(%arg0: i32, %arg1: i32, %arg2: i32) -> (i32, i32) {
    %c0_i32 = arith.constant 0 : i32
    return %arg0, %arg1 : i32, i32
  }
}

</mosaic_0001>

<bundles_post_ra>
// kernel: tpu_custom_call.1
= control target key start
LH: loop header
LB: loop body
LE: loop exit
PB: predicated region body
PF: predicated region fallthrough
CT: control target
= control target key end

     0   :  { %11 = vsyncpa [#allocation5], 0  ;;  %s363_s0 = inlined_call_operand.<no memory space> [shape: f32[1], index: 0, kind: input, shape index: {}]   ;;  %s364_s1 = inlined_call_operand.<no memory space> [shape: f32[1], index: 1, kind: input, shape index: {}]   ;;  %s365_s2 = inlined_call_operand.hbm [shape: f32[1,8,32], index: 2, kind: input, shape index: {}]   ;;  %s366_s3 = inlined_call_operand.hbm [shape: f32[1,8,32], index: 3, kind: input, shape index: {}]   ;;  %s367_s4 = inlined_call_operand.hbm [shape: f32[1,8], index: 4, kind: output, shape index: {}]  }
   0x1   :  { %12 = vsyncpa [#allocation8], 0 }
   0x2   :  { %13 = vsyncpa [#allocation6], 0  ;;  %s316_s15 = smov [#allocation4]   ;;  %s317_s17 = smov [#allocation7]  }
   0x3   :  { %s24_s16 = sshll.u32 %s316_s15, 4  ;;  %s34_s18 = sshll.u32 %s317_s17, 4  ;;  %s25_s16 = int_to_ptr.vmem [resolvable:$true] %s24_s16  ;;  %s35_s18 = int_to_ptr.vmem [resolvable:$true] %s34_s18 }
   0x4   :  { %s258_s19 = scalar_lea.vmem %s25_s16, 128  ;;  %p263_p1 = scmp.lt.s32.totalorder %s25_s16, %s25_s16 }
   0x5   :  { %p259_p0 = scmp.ne.s32.totalorder %s25_s16, %s258_s19  ;;  %p264_p2 = scmp.lt.s32.totalorder %s258_s19, %s258_s19 }
   0x7   :  { %p265_p3 = por %p264_p2, %p263_p1 }
   0x9   :  { %p266_p4 = pnand %p265_p3, %p259_p0 }
   0xb   :  { %269 = shalt.err (!%p266_p4)
}
   0xc   :  { %27 = dma.hbm_to_vmem [thread:$0]  %s365_s2, 128, %s25_s16, [#allocation5]  }
   0xd   :  { %s278_s22 = scalar_lea.vmem %s35_s18, 128  ;;  %p283_p6 = scmp.lt.s32.totalorder %s35_s18, %s35_s18 }
   0xe   :  { %p279_p5 = scmp.ne.s32.totalorder %s35_s18, %s278_s22  ;;  %p284_p7 = scmp.lt.s32.totalorder %s278_s22, %s278_s22 }
  0x10   :  { %p285_p8 = por %p284_p7, %p283_p6 }
  0x12   :  { %p286_p9 = pnand %p285_p8, %p279_p5 }
  0x14   :  { %289 = shalt.err (!%p286_p9)
}
  0x15   :  { %37 = dma.hbm_to_vmem [thread:$0]  %s366_s3, 128, %s35_s18, [#allocation8]  }
  0x16   :  { %310 = dma.done.wait [#allocation5], 128  }
  0x17   :  { %311 = vsyncadd [#allocation5], 4294967168 }
  0x18   :  { %312 = dma.done.wait [#allocation8], 128  }
  0x19   :  { %313 = vsyncadd [#allocation8], 4294967168  ;;  %vm48_vm0 = vcmask 57344   ;;  %v318_v0 = vmov 0.0   ;;  %vm319_vm1 = vmmov 0   ;;  %vm52_vm2 = vcmask 261120  }
  0x1a   :  { %49 = vst.msk [vmem:[#allocation9] sm:$0x1] %vm48_vm0, %v318_v0  ;;  %236 = vmatprep.subr.mxu0 %v318_v0  ;;  %238 = vmatprep.mubr.msk.f32.mxu0 %vm319_vm1, %v318_v0  ;;  %v51_v1 = vld [vmem:[#allocation7] sm:$0xff]  ;;  %v50_v2 = vld [vmem:[#allocation4] sm:$0xff]  ;;  %v145_v3 = vlaneseq  ;;  %v130_v4 = vstv %s363_s0  ;;  %v133_v6 = vstv %s364_s1  ;;  %vm173_vm5 = vcmask 64512   ;;  %s320_s0 = smov [#allocation9]  }
  0x1b   :  { %237 = vmatpush3.xpose.msk.msra.mxu0 %vm52_vm2, %v51_v1  ;;  %s222_s1 = sshll.u32 %s320_s0, 4  ;;  %s223_s1 = int_to_ptr.vmem [resolvable:$true] %s222_s1 }
  0x1c   :  { %v146_v7 = vshrl.u32 %v145_v3, 7  ;;  %v150_v8 = vand.u32 127, %v145_v3  ;;  %s290_s27 = scalar_lea.vmem %s223_s1, 16  ;;  %s294_s28 = scalar_lea.vmem %s223_s1, 32 }
  0x1d   :  { %p291_p10 = scmp.ne.s32.totalorder %s223_s1, %s290_s27  ;;  %p295_p11 = scmp.lt.s32.totalorder %s223_s1, %s223_s1 }
  0x1e   :  { %239 = vmatmul.mubr.msk.f32.vlgmr.msra.gmra.mxu0 %vm52_vm2, %v50_v2  ;;  %vm153_vm3 = vcmp.eq.s32.totalorder %v146_v7, %v150_v8  ;;  %p296_p12 = scmp.lt.s32.totalorder %s294_s28, %s290_s27 }
  0x20   :  { %p297_p13 = por %p296_p12, %p295_p11 }
  0x21   :  { %v156_v35 = vld [vmem:[#allocation9] sm:$0x1] }
  0x22   :  { %p298_p0 = pnand %p297_p13, %p291_p10 }
  0xde   :  { %v125_v5 = vpop.f32.mrf.mxu0 }
  0xdf   :  { %v131_v9 = vmul.f32 %v130_v4, %v125_v5 }
  0xe0   :  { %v240_v10 = vpop.f32.mrf.mxu0 }
  0xe1   :  { %v134_v11 = vadd.f32 %v133_v6, %v131_v9 }
  0xe3   :  { %v154_v12 = vsub.f32 0.0, %v134_v11 }
  0xe5   :  { %v155_v13 = vsel %vm153_vm3, %v134_v11, %v154_v12 }
  0xe6   :  { %v159_v14 = vand.u32 2147483647, %v155_v13  ;;  %v157_v21 = vmin.f32 %v155_v13, 0.0 }
  0xe8   :  { %v160_v15 = vsub.f32 0.0, %v159_v14  ;;  %v158_v26 = vsub.f32 0.0, %v157_v21 }
  0xea   :  { %v161_v16 = vmul.f32 1.442695, %v160_v15 }
  0xec   :  { %246 = vpow2.f32 %v161_v16 }
  0xf9   :  { %v247_v17 = vpop.eup %246 }
  0xfa   :  { %v163_v18 = vadd.f32 1.0, %v247_v17  ;;  %v166_v19 = vmul.f32 -0.5, %v247_v17  ;;  %v169_v22 = vand.u32 2147483647, %v247_v17 }
  0xfc   :  { %248 = vlog2.f32 %v163_v18  ;;  %v167_v20 = vadd.f32 1.0, %v166_v19  ;;  %vm170_vm4 = vcmp.lt.f32.partialorder %v169_v22, 0.0004427343 }
  0xfe   :  { %v168_v25 = vmul.f32 %v247_v17, %v167_v20 }
 0x109   :  { %v249_v23 = vpop.eup %248 }
 0x10a   :  { %v165_v24 = vmul.f32 0.6931472, %v249_v23 }
 0x10c   :  { %v171_v27 = vsel %vm170_vm4, %v168_v25, %v165_v24 }
 0x10d   :  { %v172_v28 = vadd.f32 %v171_v27, %v158_v26 }
 0x10f   :  { %v174_v29 = vsel %vm173_vm5, %v172_v28, 0.0 }
 0x110   :  { %v175_v30 = vrot.slane %v174_v29, 4 }
 0x112   :  { %v176_v31 = vadd.f32 %v175_v30, %v174_v29 }
 0x114   :  { %v177_v32 = vrot.slane %v176_v31, 2 }
 0x116   :  { %v178_v33 = vadd.f32 %v177_v32, %v176_v31 }
 0x118   :  { %v179_v34 = vrot.slane %v178_v33, 1 }
 0x11a   :  { %v180_v36 = vadd.f32 %v179_v34, %v178_v33 }
 0x11c   :  { %v181_v37 = vadd.f32 %v180_v36, %v156_v35 }
 0x11e   :  { %183 = vst.msk [vmem:[#allocation9] sm:$0x1] %vm48_vm0, %v181_v37 }
 0x11f   :  { %301 = shalt.err (!%p298_p0)
}
 0x120   :  { %225 = dma.vmem_to_hbm [thread:$0]  %s223_s1, 16, %s367_s4, [#allocation6]  }
 0x121   :  { %314 = dma.done.wait [#allocation6], 16  }
 0x122   :  { %315 = vsyncadd [#allocation6], 4294967280 }
 0x123   :  { %229 = vsyncpa [#allocation5], 1 }
 0x124   :  { %230 = vsyncpa [#allocation8], 1 }
 0x125   :  { %231 = vsyncpa [#allocation6], 1 }

</bundles_post_ra>
